<compile_context>
chip_gen: v7x
topology: tpu7x:2x2x1
jax: 0.10.0
libtpu: 0.0.40
codegen_flags: <defaults>
</compile_context>

<pallas_src>
import math

import jax
import jax.numpy as jnp
from jax.experimental import pallas as pl
from jax.experimental.pallas import tpu as pltpu

_LANES = 1024           # lane-dense output: large multiple of 128 -> unmasked full-width vst
_MAX_BLOCK_ROWS = 512   # 512 x 1024 f32 = 2 MiB per array per pipeline buffer


def _additive_threat_kernel(inp_ref, pert_ref, out_ref):
    # Additive threat model: output = input + perturbation.
    # Explicit store-side cast keeps mixed-dtype calls (e.g. bf16 input +
    # f32 perturbation) well defined and the store a full-width vst.
    out_ref[...] = (inp_ref[...] + pert_ref[...]).astype(out_ref.dtype)


def _choose_tiling(total):
    """Return (padded_rows, block_rows, pad_elems) for a lane-dense 2D view."""
    rows = pl.cdiv(total, _LANES)
    if rows <= _MAX_BLOCK_ROWS:
        if rows >= 16 and rows % 16 == 0:
            block_rows = rows // 2      # >=2 grid steps -> both v7x TCs get work
        else:
            block_rows = rows           # block == full dim -> always layout-legal
        padded_rows = rows
    else:
        block_rows = next(
            (br for br in (512, 256, 128, 64, 32, 16, 8) if rows % br == 0), None
        )
        if block_rows is None:
            # rows not a multiple of 8: pad rows up so blocks divide exactly.
            block_rows = _MAX_BLOCK_ROWS
            padded_rows = pl.cdiv(rows, block_rows) * block_rows
        else:
            padded_rows = rows
    pad_elems = padded_rows * _LANES - total
    return padded_rows, block_rows, pad_elems


def batch_threat_model(input, target, perturbation, *, in_place=False):
    """JAX/Pallas equivalent of BatchThreatModel(Additive()).forward.

    input, perturbation: arrays of identical shape (N, ...).
    target: unused by the Additive inner threat model (kept for signature parity).
    in_place: alias `input`'s buffer to the output (cuts HBM traffic ~1/3);
              only enable when the caller no longer needs the unperturbed input.
    """
    del target  # TODO(synk): only mask/overlay-style inner threat models consume target.
    assert input.shape == perturbation.shape, "input/perturbation shape mismatch"

    orig_shape = input.shape
    out_dtype = jnp.result_type(input.dtype, perturbation.dtype)
    total = math.prod(orig_shape)

    padded_rows, block_rows, pad_elems = _choose_tiling(total)

    def to_2d(x):
        flat = x.reshape(-1)            # contiguous reshape: free layout plumbing
        if pad_elems:
            flat = jnp.pad(flat, (0, pad_elems))
        return flat.reshape(padded_rows, _LANES)

    inp2d = to_2d(input)
    pert2d = to_2d(perturbation)

    spec = pl.BlockSpec((block_rows, _LANES), lambda i: (i, 0))

    aliases = {}
    if in_place and input.dtype == out_dtype:
        aliases = {0: 0}                # in-place add: drops the separate output stream

    out2d = pl.pallas_call(
        _additive_threat_kernel,
        out_shape=jax.ShapeDtypeStruct((padded_rows, _LANES), out_dtype),
        grid=(padded_rows // block_rows,),
        in_specs=[spec, spec],
        out_specs=spec,
        input_output_aliases=aliases,
        compiler_params=pltpu.CompilerParams(
            dimension_semantics=("parallel",),
        ),
    )(inp2d, pert2d)

    out_flat = out2d.reshape(-1)
    if pad_elems:
        out_flat = out_flat[:total]
    return out_flat.reshape(orig_shape)


if __name__ == "__main__":
    key = jax.random.PRNGKey(0)
    k_in, k_pert = jax.random.split(key)

    N, C, H, W = 2, 4, 16, 16
    x = jax.random.uniform(k_in, (N, C, H, W), dtype=jnp.float32) * 255.0
    perturbation = jax.random.normal(k_pert, (N, C, H, W), dtype=jnp.float32)
    # target is a per-sample label tensor in MART; unused by the Additive model.
    target = jnp.arange(N, dtype=jnp.int32)

    out = batch_threat_model(x, target, perturbation)
    out = jax.block_until_ready(out)

    # Reference: BatchThreatModel's per-sample loop + stack == elementwise add.
    ref = x + perturbation
    assert out.shape == (N, C, H, W)
    assert out.dtype == ref.dtype
    assert jnp.allclose(out, ref, atol=1e-6), "mismatch vs reference"

    print("KERNEL_OK")
</pallas_src>

<mosaic_0001>
module attributes {stable_mosaic.version = 11 : i64} {
  func.func @_additive_threat_kernel(%arg0: i32, %arg1: memref<2x1024xf32, #tpu.memory_space<vmem>>, %arg2: memref<2x1024xf32, #tpu.memory_space<vmem>>, %arg3: memref<2x1024xf32, #tpu.memory_space<vmem>>) attributes {dimension_semantics = [#tpu.dimension_semantics<parallel>], iteration_bounds = array<i64: 1>, scalar_prefetch = 0 : i64, scratch_operands = 0 : i64, tpu.core_type = #tpu.core_type<tc>, window_params = [{transform_indices = @transform_0, window_bounds = array<i64: 2, 1024>}, {transform_indices = @transform_1, window_bounds = array<i64: 2, 1024>}, {transform_indices = @transform_2, window_bounds = array<i64: 2, 1024>}]} {
    %c0 = arith.constant 0 : index
    %c0_0 = arith.constant 0 : index
    %0 = vector.load %arg1[%c0, %c0_0] : memref<2x1024xf32, #tpu.memory_space<vmem>>, vector<2x1024xf32>
    %c0_1 = arith.constant 0 : index
    %c0_2 = arith.constant 0 : index
    %1 = vector.load %arg2[%c0_1, %c0_2] : memref<2x1024xf32, #tpu.memory_space<vmem>>, vector<2x1024xf32>
    %2 = arith.addf %0, %1 : vector<2x1024xf32>
    %c0_3 = arith.constant 0 : index
    %c0_4 = arith.constant 0 : index
    %3 = vector.load %arg3[%c0_3, %c0_4] : memref<2x1024xf32, #tpu.memory_space<vmem>>, vector<2x1024xf32>
    tpu.vector_store %arg3[%c0_3, %c0_4], %2 {strides = array<i32>} : memref<2x1024xf32, #tpu.memory_space<vmem>>, vector<2x1024xf32>,
    return
  }
  func.func @transform_0(%arg0: i32) -> (i32, i32) {
    %c0_i32 = arith.constant 0 : i32
    %c0_i32_0 = arith.constant 0 : i32
    return %arg0, %c0_i32 : i32, i32
  }
  func.func @transform_1(%arg0: i32) -> (i32, i32) {
    %c0_i32 = arith.constant 0 : i32
    %c0_i32_0 = arith.constant 0 : i32
    return %arg0, %c0_i32 : i32, i32
  }
  func.func @transform_2(%arg0: i32) -> (i32, i32) {
    %c0_i32 = arith.constant 0 : i32
    %c0_i32_0 = arith.constant 0 : i32
    return %arg0, %c0_i32 : i32, i32
  }
}

</mosaic_0001>

<bundles_post_ra>
// kernel: tpu_custom_call.1
= control target key start
LH: loop header
LB: loop body
LE: loop exit
PB: predicated region body
PF: predicated region fallthrough
CT: control target
= control target key end

     0   :  { %7 = vsyncpa [#allocation3], 0  ;;  %s189_s0 = inlined_call_operand.hbm [shape: f32[2,1024], index: 0, kind: input, shape index: {}]   ;;  %s190_s1 = inlined_call_operand.hbm [shape: f32[2,1024], index: 1, kind: input, shape index: {}]   ;;  %s191_s2 = inlined_call_operand.hbm [shape: f32[2,1024], index: 2, kind: output, shape index: {}]  }
   0x1   :  { %8 = vsyncpa [#allocation6], 0 }
   0x2   :  { %9 = vsyncpa [#allocation4], 0  ;;  %s135_s9 = smov [#allocation2]   ;;  %s136_s11 = smov [#allocation5]  }
   0x3   :  { %s16_s10 = sshll.u32 %s135_s9, 4  ;;  %s26_s12 = sshll.u32 %s136_s11, 4  ;;  %s17_s10 = int_to_ptr.vmem [resolvable:$true] %s16_s10  ;;  %s27_s12 = int_to_ptr.vmem [resolvable:$true] %s26_s12 }
   0x4   :  { %s63_s15 = scalar_lea.hbm %s189_s0, 256 }
   0x5   :  { %p64_p0 = scmp.ne.s32.totalorder %s189_s0, %s63_s15  ;;  %p67_p1 = scmp.lt.u32.totalorder %s63_s15, %s189_s0 }
   0x7   :  { %p69_p2 = pnand %p67_p1, %p64_p0 }
   0x9   :  { %72 = shalt.err (!%p69_p2)
}
   0xa   :  { %s73_s20 = scalar_lea.vmem %s17_s10, 256  ;;  %p78_p4 = scmp.lt.s32.totalorder %s17_s10, %s17_s10 }
   0xb   :  { %p74_p3 = scmp.ne.s32.totalorder %s17_s10, %s73_s20  ;;  %p79_p5 = scmp.lt.s32.totalorder %s73_s20, %s73_s20 }
   0xd   :  { %p80_p6 = por %p79_p5, %p78_p4 }
   0xf   :  { %p81_p7 = pnand %p80_p6, %p74_p3 }
  0x11   :  { %84 = shalt.err (!%p81_p7)
}
  0x12   :  { %19 = dma.hbm_to_vmem [thread:$0]  %s189_s0, 256, %s17_s10, [#allocation3]  }
  0x13   :  { %s85_s25 = scalar_lea.hbm %s190_s1, 256 }
  0x14   :  { %p86_p8 = scmp.ne.s32.totalorder %s190_s1, %s85_s25  ;;  %p89_p9 = scmp.lt.u32.totalorder %s85_s25, %s190_s1 }
  0x16   :  { %p91_p10 = pnand %p89_p9, %p86_p8 }
  0x18   :  { %94 = shalt.err (!%p91_p10)
}
  0x19   :  { %s95_s30 = scalar_lea.vmem %s27_s12, 256  ;;  %p100_p12 = scmp.lt.s32.totalorder %s27_s12, %s27_s12 }
  0x1a   :  { %p96_p11 = scmp.ne.s32.totalorder %s27_s12, %s95_s30  ;;  %p101_p13 = scmp.lt.s32.totalorder %s95_s30, %s95_s30 }
  0x1c   :  { %p102_p0 = por %p101_p13, %p100_p12 }
  0x1e   :  { %p103_p1 = pnand %p102_p0, %p96_p11 }
  0x20   :  { %106 = shalt.err (!%p103_p1)
}
  0x21   :  { %29 = dma.hbm_to_vmem [thread:$0]  %s190_s1, 256, %s27_s12, [#allocation6]  }
  0x22   :  { %129 = dma.done.wait [#allocation3], 256  }
  0x23   :  { %130 = vsyncadd [#allocation3], 4294967040 }
  0x24   :  { %131 = dma.done.wait [#allocation6], 256  }
  0x25   :  { %132 = vsyncadd [#allocation6], 4294967040  ;;  %s137_s4 = smov [#allocation7]   ;;  %v36_v0 = vld [vmem:[#allocation2] sm:$0xff]  ;;  %v38_v1 = vld [vmem:[#allocation5] sm:$0xff] }
  0x26   :  { %s50_s5 = sshll.u32 %s137_s4, 4  ;;  %v37_v2 = vld [vmem:[#allocation2 + $0x8] sm:$0xff]  ;;  %v40_v3 = vadd.f32 %v38_v1, %v36_v0  ;;  %v39_v4 = vld [vmem:[#allocation5 + $0x8] sm:$0xff]  ;;  %s51_s5 = int_to_ptr.vmem [resolvable:$true] %s50_s5 }
  0x27   :  { %v41_v5 = vadd.f32 %v39_v4, %v37_v2  ;;  %s107_s6 = scalar_lea.vmem %s51_s5, 256  ;;  %p112_p3 = scmp.lt.s32.totalorder %s51_s5, %s51_s5 }
  0x28   :  { %42 = vst [vmem:[#allocation7] sm:$0xff] %v40_v3  ;;  %p108_p2 = scmp.ne.s32.totalorder %s51_s5, %s107_s6  ;;  %p113_p4 = scmp.lt.s32.totalorder %s107_s6, %s107_s6 }
  0x29   :  { %43 = vst [vmem:[#allocation7 + $0x8] sm:$0xff] %v41_v5 }
  0x2a   :  { %p114_p5 = por %p113_p4, %p112_p3 }
  0x2c   :  { %p115_p6 = pnand %p114_p5, %p108_p2 }
  0x2e   :  { %118 = shalt.err (!%p115_p6)
}
  0x2f   :  { %s119_s8 = scalar_lea.hbm %s191_s2, 256 }
  0x30   :  { %p120_p7 = scmp.ne.s32.totalorder %s191_s2, %s119_s8  ;;  %p123_p8 = scmp.lt.u32.totalorder %s119_s8, %s191_s2 }
  0x32   :  { %p125_p9 = pnand %p123_p8, %p120_p7 }
  0x34   :  { %128 = shalt.err (!%p125_p9)
}
  0x35   :  { %53 = dma.vmem_to_hbm [thread:$0]  %s51_s5, 256, %s191_s2, [#allocation4]  }
  0x36   :  { %133 = dma.done.wait [#allocation4], 256  }
  0x37   :  { %134 = vsyncadd [#allocation4], 4294967040 }
  0x38   :  { %57 = vsyncpa [#allocation3], 1 }
  0x39   :  { %58 = vsyncpa [#allocation6], 1 }
  0x3a   :  { %59 = vsyncpa [#allocation4], 1 }

</bundles_post_ra>
